<compile_context>
chip_gen: v7x
topology: tpu7x:2x2x1
jax: 0.10.0
libtpu: 0.0.40
codegen_flags: <defaults>
</compile_context>

<pallas_src>
import jax
import jax.numpy as jnp
from jax.experimental import pallas as pl
from jax.experimental.pallas import tpu as pltpu

# ----------------------------- config (small) -------------------------------
B = 2                                     # batch
N_CLIPS = 2                               # cfg.FORECASTING.NUM_INPUT_CLIPS
C_PNR, T_PNR, H_PNR, W_PNR = 3, 4, 8, 8   # per-clip x_pnr shape
C_LTA, T_LTA, H_LTA, W_LTA = 3, 8, 8, 8   # per-clip x_lta shape (one pathway)
PNR_DIM = 8192                            # proj_pnr / proj_oscc in_features
LTA_DIM = 2048                            # proj_lta in_features
FEATURE_DIM = 32                          # cfg.MODEL.TRANSLATION_INPUT_FEATURES
NUM_CLASSES = [5, 7]                      # cfg.MODEL.NUM_CLASSES
NUM_ACTIONS = 4                           # cfg.FORECASTING.NUM_ACTIONS_TO_PREDICT
SUM_CLASSES = sum(NUM_CLASSES)

F4 = 4 * FEATURE_DIM                      # lane width of every matmul (=128)
KP = N_CLIPS * C_PNR                      # pooled x_pnr contraction width (=6)
KL = N_CLIPS * C_LTA                      # pooled x_lta contraction width (=6)
ZS = NUM_ACTIONS * SUM_CLASSES            # merged head output width (=48)

# Packed weight-slab row layout (all section starts 8-sublane aligned).
ROW_WP = 0                                # (KP, 4F)  folded pnr|oscc branch weight
ROW_WL = 8                                # (KL, 4F)  folded action|lta branch weight
ROW_B_BRANCH = 16                         # (1, 4F)   concatenated branch biases
ROW_B_FC = 24                             # (1, 4F)   fc bias (+ 1.0 head-bias lane)
ROW_FC = 32                               # (4F, 4F)  fc weight (cols 0:F real)
ROW_HEAD = ROW_FC + F4                    # (4F, 4F)  merged head weight (+bias row)
SLAB_ROWS = ROW_HEAD + F4                 # 288

assert KP <= 8 and KL <= 8, "pooled channel blocks must fit one 8-row tile"
assert ZS <= F4 and FEATURE_DIM + 1 <= F4

_SPLIT_POINTS = []
_acc = 0
for _nc in NUM_CLASSES[:-1]:
    _acc += _nc
    _SPLIT_POINTS.append(_acc)


# -------------------------------- kernel ------------------------------------
def fused_kernel(xp_ref, xl_ref, w_ref, o_ref):
    """Whole TaskFusionLFLinear4Task forward in one body (no grid).

    xp_ref : (B, N*C, T*H*W)  x_pnr (free row-major reshape of the input)
    xl_ref : (B, N*C, T*H*W)  x_lta (same)
    w_ref  : (SLAB_ROWS, 4F)  packed slab: branch / fc / head weights + biases
    o_ref  : (B, 4F)          cols 0:Z*S hold the merged head logits
    """
    # 1) Per-clip spatio-temporal pooling as a lane-axis (XLU) sum; the
    #    1/(N*T*H*W) mean scale is folded into the branch weight rows.
    sp = jnp.sum(xp_ref[...], axis=-1)                       # (B, N*C)
    sl = jnp.sum(xl_ref[...], axis=-1)                       # (B, N*C)

    # 2) Folded [backbone -> proj -> clip-mean] branches.  The two dots write
    #    disjoint column ranges and are independent; their sum realizes
    #    cat(feat_pnr, feat_oscc, feat_action, feat_lta) + all branch biases.
    feat = (jnp.dot(sp, w_ref[ROW_WP:ROW_WP + KP, :],
                    preferred_element_type=jnp.float32)
            + jnp.dot(sl, w_ref[ROW_WL:ROW_WL + KL, :],
                      preferred_element_type=jnp.float32)
            + w_ref[ROW_B_BRANCH:ROW_B_BRANCH + 1, :])

    # 3) out = relu(fc(relu(feat))) as one lane-dense (4F,4F) matmul.  The fc
    #    bias row carries a 1.0 in lane F, so h[:, F] == 1 after the relu and
    #    the head bias folds into the head matmul below for free.
    h = jnp.maximum(
        jnp.dot(jnp.maximum(feat, 0.0), w_ref[ROW_FC:ROW_FC + F4, :],
                preferred_element_type=jnp.float32)
        + w_ref[ROW_B_FC:ROW_B_FC + 1, :],
        0.0)

    # 4) All Z MultiTaskHead linears (and their biases) merged into one matmul.
    #    (dropout is identity at inference; TEST.NO_ACT => no activation)
    o_ref[...] = jnp.dot(h, w_ref[ROW_HEAD:ROW_HEAD + F4, :],
                         preferred_element_type=jnp.float32)


# ------------------------------- wrappers ------------------------------------
def fold_params(raw):
    """One-time algebraic fold of every frozen linear chain into ONE slab."""
    F = FEATURE_DIM
    inv_p = 1.0 / (N_CLIPS * T_PNR * H_PNR * W_PNR)
    inv_l = 1.0 / (N_CLIPS * T_LTA * H_LTA * W_LTA)

    # [stand-in backbone -> proj] chains collapse to tiny (C, F) weights.
    w_pnr = raw["pnr_bb_w"] @ raw["proj_pnr_w"]
    b_pnr = raw["pnr_bb_b"] @ raw["proj_pnr_w"] + raw["proj_pnr_b"]
    w_oscc = raw["oscc_bb_w"] @ raw["proj_oscc_w"]
    b_oscc = raw["oscc_bb_b"] @ raw["proj_oscc_w"] + raw["proj_oscc_b"]
    w_lta = raw["lta_bb_w"] @ raw["proj_lta_w"]
    b_lta = raw["lta_bb_b"] @ raw["proj_lta_w"] + raw["proj_lta_b"]

    # Branch weights with the GAP/clip-mean scale folded in; rows duplicated
    # per clip block so the pooled (B, N*C) vectors contract directly.
    w_p = jnp.tile(jnp.concatenate([w_pnr, w_oscc], axis=1) * inv_p,
                   (N_CLIPS, 1))                                     # (KP, 2F)
    w_l = jnp.tile(jnp.concatenate([raw["act_w"], w_lta], axis=1) * inv_l,
                   (N_CLIPS, 1))                                     # (KL, 2F)

    slab = jnp.zeros((SLAB_ROWS, F4), jnp.float32)
    slab = slab.at[ROW_WP:ROW_WP + KP, 0:2 * F].set(w_p)
    slab = slab.at[ROW_WL:ROW_WL + KL, 2 * F:4 * F].set(w_l)
    slab = slab.at[ROW_B_BRANCH, :].set(
        jnp.concatenate([b_pnr, b_oscc, raw["act_b"], b_lta]))        # (4F,)
    slab = slab.at[ROW_B_FC, 0:F].set(raw["fc_b"])
    slab = slab.at[ROW_B_FC, F].set(1.0)                              # bias lane
    slab = slab.at[ROW_FC:ROW_FC + F4, 0:F].set(raw["fc_w"])          # (4F, F)
    w_head = jnp.transpose(raw["head_w"], (1, 0, 2)).reshape(F, ZS)   # (F, Z*S)
    slab = slab.at[ROW_HEAD:ROW_HEAD + F, 0:ZS].set(w_head)
    slab = slab.at[ROW_HEAD + F, 0:ZS].set(raw["head_b"].reshape(ZS))
    return slab


@jax.jit
def task_fusion_forward(x_lta, x_pnr, slab):
    Bb = x_pnr.shape[0]
    # Free row-major reshapes only: no transpose, no pad, no extra HBM copies.
    xp = x_pnr.reshape(Bb, N_CLIPS * C_PNR, T_PNR * H_PNR * W_PNR)
    xl = x_lta.reshape(Bb, N_CLIPS * C_LTA, T_LTA * H_LTA * W_LTA)

    vmem = pl.BlockSpec(memory_space=pltpu.MemorySpace.VMEM)
    out = pl.pallas_call(
        fused_kernel,
        out_shape=jax.ShapeDtypeStruct((Bb, F4), jnp.float32),
        in_specs=[vmem, vmem, vmem],
        out_specs=vmem,
    )(xp, xl, slab)

    logits = out[:, :ZS].reshape(Bb, NUM_ACTIONS, SUM_CLASSES)   # stack(dim=1)
    return tuple(jnp.split(logits, _SPLIT_POINTS, axis=-1))      # torch.split


# ------------------------- pure-JAX reference (unfolded) ---------------------
def reference_forward(x_lta, x_pnr, raw):
    Bb, Nn = x_pnr.shape[:2]
    gp_clip = x_pnr.reshape(Bb, Nn, C_PNR, -1).mean(axis=-1)      # (B, N, C)
    gl_clip = x_lta.reshape(Bb, Nn, C_LTA, -1).mean(axis=-1)      # (B, N, C)
    pnr_mid = gp_clip @ raw["pnr_bb_w"] + raw["pnr_bb_b"]         # (B, N, 8192)
    oscc_mid = gp_clip @ raw["oscc_bb_w"] + raw["oscc_bb_b"]      # (B, N, 8192)
    lta_mid = gl_clip @ raw["lta_bb_w"] + raw["lta_bb_b"]         # (B, N, 2048)
    feat_pnr = (pnr_mid @ raw["proj_pnr_w"] + raw["proj_pnr_b"]).mean(axis=1)
    feat_oscc = (oscc_mid @ raw["proj_oscc_w"] + raw["proj_oscc_b"]).mean(axis=1)
    feat_act = (gl_clip @ raw["act_w"] + raw["act_b"]).mean(axis=1)
    feat_lta = (lta_mid @ raw["proj_lta_w"] + raw["proj_lta_b"]).mean(axis=1)
    feat = jnp.concatenate([feat_pnr, feat_oscc, feat_act, feat_lta], axis=1)
    out = jax.nn.relu(jax.nn.relu(feat) @ raw["fc_w"] + raw["fc_b"])
    logits = jnp.einsum("bf,zfs->bzs", out, raw["head_w"]) + raw["head_b"][None]
    return tuple(jnp.split(logits, _SPLIT_POINTS, axis=-1))


# --------------------------------- main --------------------------------------
if __name__ == "__main__":
    key = jax.random.PRNGKey(0)
    ks = jax.random.split(key, 20)
    s = 0.05
    raw = {
        "pnr_bb_w": s * jax.random.normal(ks[0], (C_PNR, PNR_DIM), jnp.float32),
        "pnr_bb_b": s * jax.random.normal(ks[1], (PNR_DIM,), jnp.float32),
        "proj_pnr_w": s * jax.random.normal(ks[2], (PNR_DIM, FEATURE_DIM), jnp.float32),
        "proj_pnr_b": s * jax.random.normal(ks[3], (FEATURE_DIM,), jnp.float32),
        "oscc_bb_w": s * jax.random.normal(ks[4], (C_PNR, PNR_DIM), jnp.float32),
        "oscc_bb_b": s * jax.random.normal(ks[5], (PNR_DIM,), jnp.float32),
        "proj_oscc_w": s * jax.random.normal(ks[6], (PNR_DIM, FEATURE_DIM), jnp.float32),
        "proj_oscc_b": s * jax.random.normal(ks[7], (FEATURE_DIM,), jnp.float32),
        "act_w": s * jax.random.normal(ks[8], (C_LTA, FEATURE_DIM), jnp.float32),
        "act_b": s * jax.random.normal(ks[9], (FEATURE_DIM,), jnp.float32),
        "lta_bb_w": s * jax.random.normal(ks[10], (C_LTA, LTA_DIM), jnp.float32),
        "lta_bb_b": s * jax.random.normal(ks[11], (LTA_DIM,), jnp.float32),
        "proj_lta_w": s * jax.random.normal(ks[12], (LTA_DIM, FEATURE_DIM), jnp.float32),
        "proj_lta_b": s * jax.random.normal(ks[13], (FEATURE_DIM,), jnp.float32),
        "fc_w": s * jax.random.normal(ks[14], (4 * FEATURE_DIM, FEATURE_DIM), jnp.float32),
        "fc_b": s * jax.random.normal(ks[15], (FEATURE_DIM,), jnp.float32),
        "head_w": s * jax.random.normal(ks[16], (NUM_ACTIONS, FEATURE_DIM, SUM_CLASSES), jnp.float32),
        "head_b": s * jax.random.normal(ks[17], (NUM_ACTIONS, SUM_CLASSES), jnp.float32),
    }
    x_pnr = jax.random.normal(ks[18], (B, N_CLIPS, C_PNR, T_PNR, H_PNR, W_PNR), jnp.float32)
    x_lta = jax.random.normal(ks[19], (B, N_CLIPS, C_LTA, T_LTA, H_LTA, W_LTA), jnp.float32)

    slab = fold_params(raw)         # one-time fold of the frozen linear chains
    outs = jax.block_until_ready(task_fusion_forward(x_lta, x_pnr, slab))

    # NOTE: rtol is loosened because the offline fold (bb_w @ proj_w over
    # 8192/2048-wide f32 contractions) reassociates accumulation vs. the
    # reference -- expected for frozen-weight inference, not a bug.
    refs = reference_forward(x_lta, x_pnr, raw)
    for o, r, nc in zip(outs, refs, NUM_CLASSES):
        assert o.shape == (B, NUM_ACTIONS, nc), o.shape
        assert jnp.allclose(o, r, rtol=2e-3, atol=2e-4), "mismatch vs reference"

    print("KERNEL_OK")
</pallas_src>

<mosaic_0001>
module attributes {stable_mosaic.version = 11 : i64} {
  func.func @fused_kernel(%arg0: memref<2x6x256xf32, #tpu.memory_space<vmem>>, %arg1: memref<2x6x512xf32, #tpu.memory_space<vmem>>, %arg2: memref<288x128xf32, #tpu.memory_space<vmem>>, %arg3: memref<2x128xf32, #tpu.memory_space<vmem>>) attributes {dimension_semantics = [], scalar_prefetch = 0 : i64, scratch_operands = 0 : i64, tpu.core_type = #tpu.core_type<tc>} {
    %c0 = arith.constant 0 : index
    %c0_0 = arith.constant 0 : index
    %c0_1 = arith.constant 0 : index
    %0 = vector.load %arg0[%c0, %c0_0, %c0_1] : memref<2x6x256xf32, #tpu.memory_space<vmem>>, vector<2x6x256xf32>
    %cst = arith.constant dense<0.000000e+00> : vector<2x6xf32>
    %1 = vector.multi_reduction <add>, %0, %cst [2] : vector<2x6x256xf32> to vector<2x6xf32>
    %c0_2 = arith.constant 0 : index
    %c0_3 = arith.constant 0 : index
    %c0_4 = arith.constant 0 : index
    %2 = vector.load %arg1[%c0_2, %c0_3, %c0_4] : memref<2x6x512xf32, #tpu.memory_space<vmem>>, vector<2x6x512xf32>
    %cst_5 = arith.constant dense<0.000000e+00> : vector<2x6xf32>
    %3 = vector.multi_reduction <add>, %2, %cst_5 [2] : vector<2x6x512xf32> to vector<2x6xf32>
    %c0_6 = arith.constant 0 : index
    %c0_7 = arith.constant 0 : index
    %4 = vector.load %arg2[%c0_6, %c0_7] : memref<288x128xf32, #tpu.memory_space<vmem>>, vector<6x128xf32>
    %cst_8 = arith.constant dense<0.000000e+00> : vector<2x128xf32>
    %5 = tpu.matmul %1, %4, %cst_8 {dimension_numbers = #tpu.dot_dimension_numbers<[1], [0], [0], [1], [0, 0, 1, 1], [], []>} : vector<2x6xf32>, vector<6x128xf32>, vector<2x128xf32> -> vector<2x128xf32>
    %c8 = arith.constant 8 : index
    %c0_9 = arith.constant 0 : index
    %6 = vector.load %arg2[%c8, %c0_9] : memref<288x128xf32, #tpu.memory_space<vmem>>, vector<6x128xf32>
    %cst_10 = arith.constant dense<0.000000e+00> : vector<2x128xf32>
    %7 = tpu.matmul %3, %6, %cst_10 {dimension_numbers = #tpu.dot_dimension_numbers<[1], [0], [0], [1], [0, 0, 1, 1], [], []>} : vector<2x6xf32>, vector<6x128xf32>, vector<2x128xf32> -> vector<2x128xf32>
    %8 = arith.addf %5, %7 : vector<2x128xf32>
    %c16 = arith.constant 16 : index
    %c0_11 = arith.constant 0 : index
    %9 = vector.load %arg2[%c16, %c0_11] : memref<288x128xf32, #tpu.memory_space<vmem>>, vector<1x128xf32>
    %10 = vector.broadcast %9 : vector<1x128xf32> to vector<2x128xf32>
    %11 = arith.addf %8, %10 : vector<2x128xf32>
    %cst_12 = arith.constant 0.000000e+00 : f32
    %12 = vector.broadcast %cst_12 : f32 to vector<2x128xf32>
    %13 = arith.maximumf %11, %12 : vector<2x128xf32>
    %c32 = arith.constant 32 : index
    %c0_13 = arith.constant 0 : index
    %14 = vector.load %arg2[%c32, %c0_13] : memref<288x128xf32, #tpu.memory_space<vmem>>, vector<128x128xf32>
    %cst_14 = arith.constant dense<0.000000e+00> : vector<2x128xf32>
    %15 = tpu.matmul %13, %14, %cst_14 {dimension_numbers = #tpu.dot_dimension_numbers<[1], [0], [0], [1], [0, 0, 1, 1], [], []>} : vector<2x128xf32>, vector<128x128xf32>, vector<2x128xf32> -> vector<2x128xf32>
    %c24 = arith.constant 24 : index
    %c0_15 = arith.constant 0 : index
    %16 = vector.load %arg2[%c24, %c0_15] : memref<288x128xf32, #tpu.memory_space<vmem>>, vector<1x128xf32>
    %17 = vector.broadcast %16 : vector<1x128xf32> to vector<2x128xf32>
    %18 = arith.addf %15, %17 : vector<2x128xf32>
    %cst_16 = arith.constant 0.000000e+00 : f32
    %19 = vector.broadcast %cst_16 : f32 to vector<2x128xf32>
    %20 = arith.maximumf %18, %19 : vector<2x128xf32>
    %c160 = arith.constant 160 : index
    %c0_17 = arith.constant 0 : index
    %21 = vector.load %arg2[%c160, %c0_17] : memref<288x128xf32, #tpu.memory_space<vmem>>, vector<128x128xf32>
    %cst_18 = arith.constant dense<0.000000e+00> : vector<2x128xf32>
    %22 = tpu.matmul %20, %21, %cst_18 {dimension_numbers = #tpu.dot_dimension_numbers<[1], [0], [0], [1], [0, 0, 1, 1], [], []>} : vector<2x128xf32>, vector<128x128xf32>, vector<2x128xf32> -> vector<2x128xf32>
    %c0_19 = arith.constant 0 : index
    %c0_20 = arith.constant 0 : index
    %23 = vector.load %arg3[%c0_19, %c0_20] : memref<2x128xf32, #tpu.memory_space<vmem>>, vector<2x128xf32>
    tpu.vector_store %arg3[%c0_19, %c0_20], %22 {strides = array<i32>} : memref<2x128xf32, #tpu.memory_space<vmem>>, vector<2x128xf32>,
    return
  }
}

</mosaic_0001>

<bundles_post_ra>
// kernel: split.1
= control target key start
LH: loop header
LB: loop body
LE: loop exit
PB: predicated region body
PF: predicated region fallthrough
CT: control target
= control target key end

     0   :  { %v4_v0 = vlaneseq  ;;  %s94_s0 = inlined_call_operand.vmem [shape: f32[2,4,12], index: 0, kind: input, shape index: {}]   ;;  %s95_s1 = inlined_call_operand.hbm [shape: f32[2,4,7], index: 1, kind: output, shape index: {}]  }
   0x1   :  { %2 = vsyncpa [#allocation6], 0  ;;  %v3_v1 = vld [vmem:[%s94_s0] sm:$0xf]  ;;  %v33_v3 = vld [vmem:[%s94_s0 + $0x4] sm:$0xf] }
   0x2   :  { %v5_v2 = vand.u32 127, %v4_v0  ;;  %s62_s0 = smov 123   ;;  %s63_s10 = smov [#allocation5]  }
   0x3   :  { %s24_s11 = sshll.u32 %s63_s10, 4  ;;  %s25_s11 = int_to_ptr.vmem [resolvable:$true] %s24_s11 }
   0x4   :  { %vm6_vm0 = vcmp.lt.s32.totalorder %v5_v2, 5  ;;  %s38_s12 = scalar_lea.vmem %s25_s11, 128  ;;  %p43_p1 = scmp.lt.s32.totalorder %s25_s11, %s25_s11 }
   0x5   :  { %v7_v4 = vsel %vm6_vm0, 0, %v3_v1  ;;  %v16_v5 = vsel %vm6_vm0, 0, %v33_v3  ;;  %p39_p0 = scmp.ne.s32.totalorder %s25_s11, %s38_s12  ;;  %p44_p2 = scmp.lt.s32.totalorder %s38_s12, %s38_s12 }
   0x6   :  { %8 = vrot.lane.b32.xlu0 %v7_v4, %s62_s0 }
   0x7   :  { %p45_p3 = por %p44_p2, %p43_p1 }
   0x9   :  { %p46_p4 = pnand %p45_p3, %p39_p0 }
   0xa   :  { %17 = vrot.lane.b32.xlu0 %v16_v5, %s62_s0 }
  0x78   :  { %v9_v6 = vpop.permute.xlu0 %8 }
  0x79   :  { %10 = vst [vmem:[#allocation5] sm:$0xf] %v9_v6 }
  0x7c   :  { %v18_v7 = vpop.permute.xlu0 %17 }
  0x7d   :  { %20 = vst [vmem:[#allocation5 + $0x4] sm:$0xf] %v18_v7 }
  0x7e   :  { %49 = shalt.err (!%p46_p4)
}
  0x7f   :  { %s50_s15 = scalar_lea.hbm %s95_s1, 128 }
  0x80   :  { %p51_p5 = scmp.ne.s32.totalorder %s95_s1, %s50_s15  ;;  %p54_p6 = scmp.lt.u32.totalorder %s50_s15, %s95_s1 }
  0x82   :  { %p56_p7 = pnand %p54_p6, %p51_p5 }
  0x84   :  { %59 = shalt.err (!%p56_p7)
}
  0x85   :  { %s64_s20 = smov 64   ;;  %s65_s21 = smov 4  }
  0x86   :  { %30 = dma.vmem_to_hbm [thread:$0]  %s25_s11, 128, %s95_s1, [#allocation6], %s64_s20, %s64_s20, %s65_s21  }
  0x87   :  { %60 = dma.done.wait [#allocation6], 128  }
  0x88   :  { %61 = vsyncadd [#allocation6], 4294967168 }
  0x89   :  { %32 = vsyncpa [#allocation6], 1 }

</bundles_post_ra>
